<compile_context>
chip_gen: v7x
topology: tpu7x:2x2x1
jax: 0.10.0
libtpu: 0.0.40
codegen_flags: <defaults>
</compile_context>

<pallas_src>
import math

import jax
import jax.numpy as jnp
from jax.experimental import pallas as pl
from jax.experimental.pallas import tpu as pltpu


# ----------------------------------------------------------------------------
# Parameter init (deterministic JAX port of init_nd_freqs)
# ----------------------------------------------------------------------------
def init_nd_freqs(position_dim, head_dim, num_heads, theta=10.0, rotate=True,
                  key=None, dtype=jnp.float32):
    """Returns freqs of shape [num_heads, head_dim // 2, position_dim]."""
    assert head_dim % 4 == 0
    thetas = jnp.full((position_dim,), theta, dtype=dtype)
    exponents = jnp.arange(0, head_dim, 4, dtype=dtype) / head_dim
    mag = 1.0 / thetas[:, None] ** exponents[None, :]          # [P, head_dim//4]

    if rotate:
        assert key is not None
        angles = jax.random.uniform(key, (num_heads,), dtype=dtype) * 2.0 * jnp.pi
    else:
        angles = jnp.zeros((num_heads,), dtype=dtype)

    per_dim = []
    for i in range(position_dim):
        f1 = mag[i][None, :] * jnp.cos(angles[:, None] + jnp.pi * 2 * i / (2 * position_dim))
        f2 = mag[i][None, :] * jnp.cos(angles[:, None] + jnp.pi * (2 * i + 1) / (2 * position_dim))
        per_dim.append(jnp.concatenate([f1, f2], axis=-1))     # [H, head_dim//2]
    freqs = jnp.stack(per_dim, axis=-1)                        # [H, head_dim//2, P]
    return freqs


# ----------------------------------------------------------------------------
# Pallas kernel: single-trig rotation, fully lane-dense at width E
# ----------------------------------------------------------------------------
def _rope_kernel(pos_ref, x_ref, f_ref, o_ref):
    # pos_ref : [TN, P]    f32 positions
    # x_ref   : [TN, E]    query/key tile (input dtype)
    # f_ref   : [P+1, E]   f32 resident constants:
    #             rows 0..P-1 : pair-repeated UNSIGNED freqs
    #                           f[p, 2j] = f[p, 2j+1] = freq[j, p]
    #             row  P      : phase bias, exactly 0.0 at even lanes,
    #                           -pi/2 at odd lanes
    # o_ref   : [TN, E]    rotated output (input dtype)
    p_dim = pos_ref.shape[-1]
    e = x_ref.shape[-1]
    pos = pos_ref[...]
    x = x_ref[...].astype(jnp.float32)

    # Phase via short unrolled VPU FMA (P = 2-3) + resident bias row:
    #   phase[:, 2j] = phi_j ; phase[:, 2j+1] = phi_j - pi/2
    phase = pos[:, 0:1] * f_ref[0:1, :] + f_ref[p_dim:p_dim + 1, :]
    for d in range(1, p_dim):
        phase = phase + pos[:, d:d + 1] * f_ref[d:d + 1, :]

    # Single trig evaluation (half the VALU polynomial work of cos+sin):
    #   t[:, 2j] = cos(phi_j),  t[:, 2j+1] = cos(phi_j - pi/2) = sin(phi_j)
    t = jnp.cos(phase)

    # Grid-invariant lane-parity mask from the resident bias row (exact 0.0 on
    # even lanes) -> no per-step full-tile iota / compare.
    even = f_ref[p_dim:p_dim + 1, :] == 0.0                 # [1, E] bool

    # swapped[:, 2j] = x[:, 2j+1], swapped[:, 2j+1] = x[:, 2j]   (XLU rolls).
    # Wrap-around lanes of each roll only land at parities the select discards
    # (E is even, pairs never straddle the block edge).
    swapped = jnp.where(even,
                        pltpu.roll(x, e - 1, axis=1),       # x[k+1] at even k
                        pltpu.roll(x, 1, axis=1))           # x[k-1] at odd  k

    u = x * t          # u[2j] = x[2j]*cos_j   ; u[2j+1] = x[2j+1]*sin_j
    v = swapped * t    # v[2j] = x[2j+1]*cos_j ; v[2j+1] = x[2j]*sin_j

    # out[2j]   = u[2j] - u[2j+1] = x[2j]*cos_j   - x[2j+1]*sin_j
    # out[2j+1] = v[2j] + v[2j+1] = x[2j+1]*cos_j + x[2j]*sin_j
    out_even = u - pltpu.roll(u, e - 1, axis=1)             # uses u[k+1]; even k only
    out_odd = v + pltpu.roll(v, 1, axis=1)                  # uses v[k-1]; odd  k only
    o_ref[...] = jnp.where(even, out_even, out_odd).astype(o_ref.dtype)


def _round_up(a, b):
    return ((a + b - 1) // b) * b


_TARGET_BLOCK_BYTES = 2 << 20     # ~2 MiB f32 activation block (HBM-roofline plateau)
_VMEM_LIMIT_BYTES = 48 << 20      # explicit scoped-VMEM cap; headroom under v7x's 64 MiB


def _apply_rope_pallas(x_flat, pos_flat, f_aug):
    """x_flat: [N, E]; pos_flat: [N, P] f32; f_aug: [P+1, E] f32 -> [N, E]."""
    n, e = x_flat.shape
    p = pos_flat.shape[-1]
    assert f_aug.shape == (p + 1, e)

    if n <= 8:
        tile_n = n   # single block; second-minor dim equals the full array dim
    else:
        # ~2 MiB of f32 rows per block, but keep >= 4 grid steps so both v7x
        # TensorCores engage and the DMA pipeline has overlap.
        cap_rows = max(8, ((_TARGET_BLOCK_BYTES // (4 * e)) // 8) * 8)
        quarter = max(8, _round_up(pl.cdiv(n, 4), 8))
        tile_n = min(cap_rows, quarter)

    # Ragged last block is masked by Pallas -> no jnp.pad / output slice passes.
    grid = (pl.cdiv(n, tile_n),)
    return pl.pallas_call(
        _rope_kernel,
        out_shape=jax.ShapeDtypeStruct((n, e), x_flat.dtype),
        grid_spec=pltpu.PrefetchScalarGridSpec(
            num_scalar_prefetch=0,
            grid=grid,
            in_specs=[
                pl.BlockSpec((tile_n, p), lambda i: (i, 0)),
                pl.BlockSpec((tile_n, e), lambda i: (i, 0)),
                pl.BlockSpec((p + 1, e), lambda i: (0, 0)),   # tiny, VMEM-resident
            ],
            out_specs=pl.BlockSpec((tile_n, e), lambda i: (i, 0)),
        ),
        compiler_params=pltpu.CompilerParams(
            dimension_semantics=("parallel",),
            vmem_limit_bytes=_VMEM_LIMIT_BYTES),
    )(pos_flat, x_flat, f_aug)


# ----------------------------------------------------------------------------
# Module wrapper
# ----------------------------------------------------------------------------
class RoPEEncodingND:
    def __init__(self, position_dim, embed_dim, n_heads, rope_base_theta=10.0,
                 key=jax.random.PRNGKey(0)):
        if embed_dim % n_heads != 0:
            raise ValueError("embed_dim must be divisible by n_heads")
        self.pos_dim = position_dim
        self.embed_dim = embed_dim
        self.n_heads = n_heads
        self.head_dim = embed_dim // n_heads
        if self.head_dim % 2 != 0:
            raise ValueError("head_dim must be divisible by 2")
        self.freqs = init_nd_freqs(position_dim, self.head_dim, n_heads,
                                   rope_base_theta, rotate=True, key=key)
        assert self.freqs.shape == (n_heads, self.head_dim // 2, position_dim)
        self._f_aug = self._build_freq_constants()

    def _build_freq_constants(self):
        # [H, head_dim//2, P] -> channel-major flat [E/2, P] (matches torch's
        # freqs.view(-1, pos_dim)); pair-repeat each channel to lanes (2j, 2j+1)
        # UNSIGNED, and append a bias row (0, -pi/2, 0, -pi/2, ...) so that
        # cos(pos @ F + bias) = [cos(phi_j), sin(phi_j)] interleaved.
        half = self.embed_dim // 2
        ff = self.freqs.reshape(half, self.pos_dim).astype(jnp.float32)   # [E/2, P]
        f_rep = jnp.repeat(ff, 2, axis=0).T                               # [P, E]
        bias = jnp.tile(jnp.asarray([0.0, -jnp.pi / 2.0], jnp.float32),
                        half)[None, :]                                    # [1, E]
        return jnp.concatenate([f_rep, bias], axis=0)                     # [P+1, E]

    def _run(self, x_flat, pos_flat):
        return _apply_rope_pallas(x_flat, pos_flat, self._f_aug)

    def __call__(self, query, query_pos, key=None, key_pos=None):
        # TODO(synk): the PyTorch module emits a UserWarning when positions look
        # normalized (max <= 1); host-side warnings are omitted here.
        lead_q = query.shape[:-1]
        nq = math.prod(lead_q)
        q_flat = query.reshape(nq, self.embed_dim)
        qp_flat = query_pos.reshape(nq, self.pos_dim).astype(jnp.float32)

        if key is None:
            out = self._run(q_flat, qp_flat)
            return out.reshape(lead_q + (self.embed_dim,))

        lead_k = key.shape[:-1]
        nk = math.prod(lead_k)
        k_flat = key.reshape(nk, self.embed_dim)
        kp = key_pos if key_pos is not None else query_pos
        kp_flat = kp.reshape(nk, self.pos_dim).astype(jnp.float32)

        # Tiny problems: batch q and k through one pallas_call (saves a launch +
        # pipeline warm-up/drain).  Gated by a byte budget so the concat/split
        # HBM copies never exceed what one extra launch would cost.
        total_bytes = (nq + nk) * self.embed_dim * jnp.dtype(query.dtype).itemsize
        if (query.dtype == key.dtype) and total_bytes <= (2 << 20):
            out = self._run(jnp.concatenate([q_flat, k_flat], axis=0),
                            jnp.concatenate([qp_flat, kp_flat], axis=0))
            q_out = out[:nq].reshape(lead_q + (self.embed_dim,))
            k_out = out[nq:].reshape(lead_k + (self.embed_dim,))
        else:
            q_out = self._run(q_flat, qp_flat).reshape(lead_q + (self.embed_dim,))
            k_out = self._run(k_flat, kp_flat).reshape(lead_k + (self.embed_dim,))
        return q_out, k_out


# ----------------------------------------------------------------------------
# Pure-JAX reference (mirrors the torch math) for validation
# ----------------------------------------------------------------------------
def _rope_reference(x, pos, freqs):
    lead = x.shape[:-1]
    embed_dim = x.shape[-1]
    pos_dim = pos.shape[-1]
    phase = pos.reshape(-1, pos_dim).astype(jnp.float32) @ freqs.reshape(-1, pos_dim).T
    c, s = jnp.cos(phase), jnp.sin(phase)
    xp = x.astype(jnp.float32).reshape(-1, embed_dim // 2, 2)
    q_re, q_im = xp[..., 0], xp[..., 1]
    o_re = q_re * c - q_im * s
    o_im = q_re * s + q_im * c
    out = jnp.stack([o_re, o_im], axis=-1).reshape(lead + (embed_dim,))
    return out.astype(x.dtype)


if __name__ == "__main__":
    root = jax.random.PRNGKey(0)
    k_freq, k_q, k_k, k_qp, k_kp, k_freq2, k_q2, k_qp2 = jax.random.split(root, 8)

    # --- Test 1: f32, 2-D positions, query + key (concat fast path) --------
    position_dim, embed_dim, n_heads = 2, 32, 2
    batch, seq = 2, 8
    rope = RoPEEncodingND(position_dim, embed_dim, n_heads,
                          rope_base_theta=10.0, key=k_freq)

    query = jax.random.normal(k_q, (batch, seq, embed_dim), dtype=jnp.float32)
    key_t = jax.random.normal(k_k, (batch, seq, embed_dim), dtype=jnp.float32)
    query_pos = jax.random.uniform(k_qp, (batch, seq, position_dim),
                                   dtype=jnp.float32) * 16.0
    key_pos = jax.random.uniform(k_kp, (batch, seq, position_dim),
                                 dtype=jnp.float32) * 16.0

    q_rot, k_rot = rope(query, query_pos, key_t, key_pos)
    q_rot = jax.block_until_ready(q_rot)
    k_rot = jax.block_until_ready(k_rot)

    q_ref = _rope_reference(query, query_pos, rope.freqs)
    k_ref = _rope_reference(key_t, key_pos, rope.freqs)
    assert q_rot.shape == query.shape and q_rot.dtype == query.dtype
    assert k_rot.shape == key_t.shape and k_rot.dtype == key_t.dtype
    assert jnp.allclose(q_rot, q_ref, atol=5e-4, rtol=5e-4)
    assert jnp.allclose(k_rot, k_ref, atol=5e-4, rtol=5e-4)

    # --- Test 2: bf16, E=256 (lanes span >1 vreg), 3-D positions, ragged N --
    position_dim2, embed_dim2, n_heads2 = 3, 256, 2     # head_dim = 128
    batch2, seq2 = 2, 7                                  # N = 14 -> masked ragged last block
    rope2 = RoPEEncodingND(position_dim2, embed_dim2, n_heads2,
                           rope_base_theta=10.0, key=k_freq2)
    q2 = jax.random.normal(k_q2, (batch2, seq2, embed_dim2), dtype=jnp.bfloat16)
    qp2 = jax.random.uniform(k_qp2, (batch2, seq2, position_dim2),
                             dtype=jnp.float32) * 16.0

    q2_rot = jax.block_until_ready(rope2(q2, qp2))
    q2_ref = _rope_reference(q2, qp2, rope2.freqs)
    assert q2_rot.shape == q2.shape and q2_rot.dtype == q2.dtype
    assert jnp.allclose(q2_rot.astype(jnp.float32), q2_ref.astype(jnp.float32),
                        atol=5e-2, rtol=5e-2)

    print("KERNEL_OK")
</pallas_src>

<mosaic_0001>
module attributes {stable_mosaic.version = 11 : i64} {
  func.func @_rope_kernel(%arg0: i32, %arg1: memref<8x2xf32, #tpu.memory_space<vmem>>, %arg2: memref<8x32xf32, #tpu.memory_space<vmem>>, %arg3: memref<3x32xf32, #tpu.memory_space<vmem>>, %arg4: memref<8x32xf32, #tpu.memory_space<vmem>>) attributes {dimension_semantics = [#tpu.dimension_semantics<parallel>], iteration_bounds = array<i64: 4>, scalar_prefetch = 0 : i64, scratch_operands = 0 : i64, tpu.core_type = #tpu.core_type<tc>, window_params = [{transform_indices = @transform_0, window_bounds = array<i64: 8, 2>}, {transform_indices = @transform_1, window_bounds = array<i64: 8, 32>}, {pipeline_mode = #tpu.pipeline_mode<synchronous>, transform_indices = @transform_2, window_bounds = array<i64: 3, 32>}, {transform_indices = @transform_3, window_bounds = array<i64: 8, 32>}]} {
    %c0 = arith.constant 0 : index
    %c0_0 = arith.constant 0 : index
    %0 = vector.load %arg1[%c0, %c0_0] : memref<8x2xf32, #tpu.memory_space<vmem>>, vector<8x2xf32>
    %c0_1 = arith.constant 0 : index
    %c0_2 = arith.constant 0 : index
    %1 = vector.load %arg2[%c0_1, %c0_2] : memref<8x32xf32, #tpu.memory_space<vmem>>, vector<8x32xf32>
    %2 = vector.extract_strided_slice %0 {offsets = [0, 0], sizes = [8, 1], strides = [1, 1]} : vector<8x2xf32> to vector<8x1xf32>
    %c0_3 = arith.constant 0 : index
    %c0_4 = arith.constant 0 : index
    %3 = vector.load %arg3[%c0_3, %c0_4] : memref<3x32xf32, #tpu.memory_space<vmem>>, vector<1x32xf32>
    %4 = vector.broadcast %2 : vector<8x1xf32> to vector<8x32xf32>
    %5 = vector.broadcast %3 : vector<1x32xf32> to vector<8x32xf32>
    %6 = arith.mulf %4, %5 : vector<8x32xf32>
    %c2 = arith.constant 2 : index
    %c0_5 = arith.constant 0 : index
    %7 = vector.load %arg3[%c2, %c0_5] : memref<3x32xf32, #tpu.memory_space<vmem>>, vector<1x32xf32>
    %8 = vector.broadcast %7 : vector<1x32xf32> to vector<8x32xf32>
    %9 = arith.addf %6, %8 : vector<8x32xf32>
    %10 = vector.extract_strided_slice %0 {offsets = [0, 1], sizes = [8, 1], strides = [1, 1]} : vector<8x2xf32> to vector<8x1xf32>
    %c1 = arith.constant 1 : index
    %c0_6 = arith.constant 0 : index
    %11 = vector.load %arg3[%c1, %c0_6] : memref<3x32xf32, #tpu.memory_space<vmem>>, vector<1x32xf32>
    %12 = vector.broadcast %10 : vector<8x1xf32> to vector<8x32xf32>
    %13 = vector.broadcast %11 : vector<1x32xf32> to vector<8x32xf32>
    %14 = arith.mulf %12, %13 : vector<8x32xf32>
    %15 = arith.addf %9, %14 : vector<8x32xf32>
    %16 = math.cos %15 : vector<8x32xf32>
    %c2_7 = arith.constant 2 : index
    %c0_8 = arith.constant 0 : index
    %17 = vector.load %arg3[%c2_7, %c0_8] : memref<3x32xf32, #tpu.memory_space<vmem>>, vector<1x32xf32>
    %cst = arith.constant 0.000000e+00 : f32
    %18 = vector.broadcast %cst : f32 to vector<1x32xf32>
    %19 = arith.cmpf oeq, %17, %18 : vector<1x32xf32>
    %c31_i32 = arith.constant 31 : i32
    %20 = tpu.dynamic_rotate %1 by %c31_i32 dim 1 : vector<8x32xf32>, i32 -> vector<8x32xf32>
    %c1_i32 = arith.constant 1 : i32
    %21 = tpu.dynamic_rotate %1 by %c1_i32 dim 1 : vector<8x32xf32>, i32 -> vector<8x32xf32>
    %22 = vector.shape_cast %19 : vector<1x32xi1> to vector<1x32xi1>
    %23 = vector.broadcast %22 : vector<1x32xi1> to vector<8x32xi1>
    %24 = arith.select %23, %20, %21 : vector<8x32xi1>, vector<8x32xf32>
    %25 = arith.mulf %1, %16 : vector<8x32xf32>
    %26 = arith.mulf %24, %16 : vector<8x32xf32>
    %c31_i32_9 = arith.constant 31 : i32
    %27 = tpu.dynamic_rotate %25 by %c31_i32_9 dim 1 : vector<8x32xf32>, i32 -> vector<8x32xf32>
    %28 = arith.subf %25, %27 : vector<8x32xf32>
    %c1_i32_10 = arith.constant 1 : i32
    %29 = tpu.dynamic_rotate %26 by %c1_i32_10 dim 1 : vector<8x32xf32>, i32 -> vector<8x32xf32>
    %30 = arith.addf %26, %29 : vector<8x32xf32>
    %31 = vector.shape_cast %19 : vector<1x32xi1> to vector<1x32xi1>
    %32 = vector.broadcast %31 : vector<1x32xi1> to vector<8x32xi1>
    %33 = arith.select %32, %28, %30 : vector<8x32xi1>, vector<8x32xf32>
    %c0_11 = arith.constant 0 : index
    %c0_12 = arith.constant 0 : index
    %34 = vector.load %arg4[%c0_11, %c0_12] : memref<8x32xf32, #tpu.memory_space<vmem>>, vector<8x32xf32>
    tpu.vector_store %arg4[%c0_11, %c0_12], %33 {strides = array<i32>} : memref<8x32xf32, #tpu.memory_space<vmem>>, vector<8x32xf32>,
    return
  }
  func.func @transform_0(%arg0: i32) -> (i32, i32) {
    %c0_i32 = arith.constant 0 : i32
    %c0_i32_0 = arith.constant 0 : i32
    return %arg0, %c0_i32 : i32, i32
  }
  func.func @transform_1(%arg0: i32) -> (i32, i32) {
    %c0_i32 = arith.constant 0 : i32
    %c0_i32_0 = arith.constant 0 : i32
    return %arg0, %c0_i32 : i32, i32
  }
  func.func @transform_2(%arg0: i32) -> (i32, i32) {
    %c0_i32 = arith.constant 0 : i32
    %c0_i32_0 = arith.constant 0 : i32
    %c0_i32_1 = arith.constant 0 : i32
    return %c0_i32, %c0_i32_0 : i32, i32
  }
  func.func @transform_3(%arg0: i32) -> (i32, i32) {
    %c0_i32 = arith.constant 0 : i32
    %c0_i32_0 = arith.constant 0 : i32
    return %arg0, %c0_i32 : i32, i32
  }
}

</mosaic_0001>

<bundles_post_ra>
// kernel: tpu_custom_call.1
= control target key start
LH: loop header
LB: loop body
LE: loop exit
PB: predicated region body
PF: predicated region fallthrough
CT: control target
= control target key end

     0   :  { %8 = vsyncpa [#allocation3], 0  ;;  %s782_s0 = inlined_call_operand.vmem [shape: f32[32,2], index: 0, kind: input, shape index: {}]   ;;  %s783_s1 = inlined_call_operand.vmem [shape: f32[32,32], index: 1, kind: input, shape index: {}]   ;;  %s784_s2 = inlined_call_operand.vmem [shape: f32[3,32], index: 2, kind: input, shape index: {}]   ;;  %s785_s3 = inlined_call_operand.hbm [shape: f32[32,32], index: 3, kind: output, shape index: {}]  }
   0x1   :  { %10 = vsyncpa [#allocation3 + $0x1], 0  ;;  %s624_s12 = smov 0   ;;  %s626_s13 = smov 0  }
   0x2   :  { %s628_s14 = smov 0   ;;  %s630_s15 = smov 0  }
   0x3 LB: > { %s645_s16 = sadd.s32 4294967295, %s590_s15   ;;  %s450_s17 = sadd.s32 4294967294, %s590_s15   ;;  %s590_s15 = sphi %s630_s15, %s791_s15   ;;  %s586_s14 = sphi %s628_s14, %s790_s14   ;;  %s582_s13 = sphi %s626_s13, %s789_s13   ;;  %s578_s12 = sphi %s624_s12, %s788_s12  }
   0x4   : > { %s649_s18 = sadd.s32 1, %s590_s15   ;;  %s96_s19 = sadd.s32 1, %s586_s14 }
   0x5   : > { %s93_s20 = ssub.s32 %s590_s15, %s649_s18  ;;  %p106_p0 = scmp.ne.s32.totalorder %s586_s14, %s582_s13 }
   0x6   : > { %p94_p1 = scmp.eq.s32.totalorder %s93_s20, 0  ;;  %p107_p2 = scmp.eq.s32.totalorder %s645_s16, 3 }
   0x7   : > { %p112_p3 = scmp.ne.s32.totalorder %s582_s13, %s578_s12  ;;  %p113_p4 = scmp.eq.s32.totalorder %s450_s17, 3 }
   0x8   : > { %s660_s21 = scalar_select %p94_p1, %s586_s14, %s96_s19  }
   0x9   : > { %p662_p5 = por %p107_p2, %p106_p0  ;;  %p666_p6 = por %p113_p4, %p112_p3 }
   0xa   : > { %p453_p7 = scmp.ge.s32.totalorder %s590_s15, 1  ;;  %p148_p8 = scmp.lt.s32.totalorder %s590_s15, 5 }
   0xc   : > { %p149_p9 = pnand %p453_p7, %p148_p8 }
   0xd   : > { %p175_p10 = scmp.lt.s32.totalorder (!%p149_p9), %s645_s16, 3  ;;  %v196_v0 = vld [vmem:[%s784_s2 + $0x2] sm:$0x1] (!%p149_p9)  ;;  %v197_v1 = vlaneseq (!%p149_p9)  ;;  %v592_v2 = vmov (!%p149_p9), 0   ;;  %v593_v3 = vmov (!%p149_p9), 1   ;;  %s594_s7 = smov (!%p149_p9), 32  }
   0xe   : > { %152 = sbr.rel (%p149_p9) target bundleno = 740 (0x2e4), region = 32  ;;  %vm316_vm0 = vcmp.eq.f32.partialorder (!%p149_p9), %v196_v0, 0.0  ;;  %521 = vset.pattern.permute.xlu0 (!%p149_p9), %v592_v2  ;;  %522 = vset.pattern.permute.xlu1 (!%p149_p9), %v593_v3  ;;  %vm317_vm1 = vcmask (!%p149_p9), 1047808   ;;  %v457_v12 = vld [vmem:[%s784_s2] ss:$0 sm:$0xff] (!%p149_p9)  ;;  %s601_s17 = smov (!%p149_p9), 127  }
   0xf   : > { %v198_v4 = vshrl.u32 (!%p149_p9), %v197_v1, 7  ;;  %v324_v5 = vsel (!%p149_p9), %vm316_vm0, 1, %v592_v2  ;;  %v458_v13 = vld [vmem:[%s784_s2 + $0x1] ss:$0 sm:$0xff] (!%p149_p9)  ;;  %v595_v32 = vmov (!%p149_p9), 683565275  }
  0x10   : > { %v596_v34 = vmov (!%p149_p9), 2475754826   ;;  %v597_v36 = vmov (!%p149_p9), 2131351028   ;;  %v598_v38 = vmov (!%p149_p9), 2102212464  }
  0x11   : > { %v199_v6 = vsub.s32 (!%p149_p9), 0, %v198_v4  ;;  %v599_v40 = vmov (!%p149_p9), 920167782   ;;  %v600_v47 = vmov (!%p149_p9), 1326507024   ;;  %s602_s19 = smov (!%p149_p9), 97  }
  0x12   : > { %s172_s20 = sand.u32 (!%p149_p9), 1, %s582_s13   ;;  %s464_s25 = sshll.u32 (!%p149_p9), %s645_s16, 7  ;;  %vm363_vm0 = vcmask (!%p149_p9), 261120  }
  0x13   : > { %v685_v8 = vrot.slane (!%p149_p9), %v324_v5, %v199_v6  ;;  %v200_v15 = vrot.slane (!%p149_p9), %v196_v0, %v199_v6  ;;  %s454_s24 = sshll.u32 (!%p149_p9), %s172_s20, 3  ;;  %s603_s5 = smov (!%p149_p9), [#allocation2]  }
  0x15   : > { %s176_s26 = scalar_select %p175_p10, %s645_s16, 3  ;;  %vm329_vm15 = vcmp.eq.s32.totalorder %v685_v8, 1 }
  0x16   : > { %s366_s16 = scalar_lea.sflag [#allocation3], %s172_s20 }
  0x17   : > { %s455_s27 = sshll.u32 %s176_s26, 3  ;;  %s174_s26 = scalar_lea.vmem [#allocation2], %s454_s24 }
  0x18   : > { %s182_s30 = scalar_lea.vmem %s783_s1, %s455_s27  ;;  %s178_s6 = scalar_lea.vmem %s782_s0, %s455_s27 }
  0x19   : > { %v683_v7 = vld [vmem:[%s182_s30] sm:$0xff]  ;;  %s379_s27 = sshll.u32 %s174_s26, 4  ;;  %s738_s30 = scalar_lea.hbm %s785_s3, %s464_s25  ;;  %s740_s27 = int_to_ptr.vmem [resolvable:$true] %s379_s27 }
  0x1a   : > { %v183_v9 = vld [vmem:[%s178_s6] sm:$0xff]  ;;  %318 = vrot.lane.b32.xlu0 %v683_v7, %s594_s7  ;;  %s528_s4 = scalar_lea.vmem %s740_s27, 128  ;;  %s532_s6 = sshll.u32 %s603_s5, 4  ;;  %s533_s6 = int_to_ptr.vmem [resolvable:$false] %s532_s6 }
  0x1b   : > { %204 = vperm.xlu1 %522, %v183_v9   ;;  %p529_p11 = scmp.ne.s32.totalorder %s740_s27, %s528_s4  ;;  %p535_p0 = scmp.lt.s32.totalorder %s740_s27, %s533_s6 }
  0x1d   : > { %p530_p12 = pnand %p529_p11, %p662_p5 }
  0x1e   : > { %188 = vperm.xlu0 %521, %v183_v9  }
  0x1f   : > { %p531_p13 = pneg %p530_p12 }
  0x22   : > { %523 = vset.pattern.permute.xlu0 %v593_v3 }
  0x8c   : > { %v319_v10 = vpop.permute.xlu0 %318 }
  0x8d   : > { %v320_v11 = vsel %vm317_vm1, %v319_v10, %v683_v7 }
  0x8e   : > { %321 = vrot.lane.b32.xlu1 %v320_v11, %s594_s7 }
  0x9a   : > { %v205_v14 = vpop.permute.xlu1 %204 }
  0x9b   : > { %v211_v18 = vmul.f32 %v458_v13, %v205_v14 }
  0x9d   : > { %v189_v16 = vpop.permute.xlu0 %188 }
  0x9e   : > { %v195_v17 = vmul.f32 %v457_v12, %v189_v16 }
  0xa0   : > { %v201_v19 = vadd.f32 %v200_v15, %v195_v17 }
  0xa2   : > { %v698_v20 = vadd.f32 %v211_v18, %v201_v19 }
  0xa4   : > { %v216_v21 = vand.u32 2139095040, %v698_v20  ;;  %v213_v23 = vand.u32 2147483647, %v698_v20  ;;  %vm215_vm9 = vcmp.lt.s32.totalorder %v698_v20, 0  ;;  %vm305_vm14 = vweird.f32 %v698_v20 }
  0xa6   : > { %v217_v22 = vshrl.u32 %v216_v21, 23  ;;  %v220_v26 = vand.u32 8388607, %v213_v23  ;;  %vm214_vm10 = vcmp.le.f32.partialorder %v213_v23, 0.7853982 }
  0xa8   : > { %v459_v24 = vadd.s32 4294967169, %v217_v22  ;;  %v221_v29 = vor.u32 8388608, %v220_v26 }
  0xaa   : > { %v223_v25 = vadd.s32 1, %v459_v24  ;;  %v261_v49 = vshll.u32 %v221_v29, 8 }
  0xac   : > { %vm224_vm2 = vcmp.gt.s32.totalorder %v223_v25, 0 }
  0xad   : > { %v225_v27 = vsel %vm224_vm2, %v223_v25, 0 }
  0xae   : > { %v227_v28 = vand.u32 31, %v225_v27  ;;  %v226_v30 = vshrl.u32 %v225_v27, 5 }
  0xb0   : > { %v228_v31 = vsub.s32 32, %v227_v28  ;;  %v230_v33 = vshll.u32 %v595_v32, %v227_v28  ;;  %v233_v35 = vshll.u32 %v596_v34, %v227_v28  ;;  %v236_v37 = vshll.u32 %v597_v36, %v227_v28 }
  0xb1   : > { %v239_v39 = vshll.u32 %v598_v38, %v227_v28  ;;  %v242_v41 = vshll.u32 %v599_v40, %v227_v28  ;;  %vm245_vm3 = vcmp.lt.s32.totalorder %v226_v30, 1  ;;  %vm248_vm4 = vcmp.lt.s32.totalorder %v226_v30, 4 }
  0xb2   : > { %v229_v42 = vshrl.u32 %v595_v32, %v228_v31  ;;  %v231_v43 = vshrl.u32 %v596_v34, %v228_v31  ;;  %v234_v44 = vshrl.u32 %v597_v36, %v228_v31  ;;  %v237_v45 = vshrl.u32 %v598_v38, %v228_v31 }
  0xb3   : > { %v240_v46 = vshrl.u32 %v599_v40, %v228_v31  ;;  %v243_v48 = vshrl.u32 %v600_v47, %v228_v31  ;;  %vm246_vm5 = vcmp.lt.s32.totalorder %v226_v30, 2  ;;  %vm247_vm6 = vcmp.lt.s32.totalorder %v226_v30, 3 }
  0xb4   : > { %v232_v50 = vor.u32 %v231_v43, %v230_v33  ;;  %v235_v51 = vor.u32 %v234_v44, %v233_v35  ;;  %v238_v52 = vor.u32 %v237_v45, %v236_v37 }
  0xb5   : > { %v241_v53 = vor.u32 %v240_v46, %v239_v39  ;;  %v244_v54 = vor.u32 %v243_v48, %v242_v41 }
  0xb6   : > { %v249_v55 = vsel %vm245_vm3, %v229_v42, %v232_v50  ;;  %v250_v56 = vsel %vm248_vm4, %v238_v52, 2102212464  ;;  %v253_v57 = vsel %vm245_vm3, %v232_v50, %v235_v51  ;;  %v257_v58 = vsel %vm245_vm3, %v235_v51, %v238_v52 }
  0xb7   : > { %v251_v59 = vsel %vm247_vm6, %v235_v51, %v250_v56  ;;  %v254_v60 = vsel %vm248_vm4, %v241_v53, 920167782  ;;  %v258_v61 = vsel %vm248_vm4, %v244_v54, 1326507024 }
  0xb8   : > { %v255_v62 = vsel %vm247_vm6, %v238_v52, %v254_v60  ;;  %v259_v63 = vsel %vm247_vm6, %v241_v53, %v258_v61  ;;  %v252_v0 = vsel %vm246_vm5, %v249_v55, %v251_v59 }
  0xb9   : > { %v256_v1 = vsel %vm246_vm5, %v253_v57, %v255_v62  ;;  %v260_v2 = vsel %vm246_vm5, %v257_v58, %v259_v63  ;;  %v268_v9 = vmul.u32 %v261_v49, %v252_v0 }
  0xba   : > { %v704_v3 = vmul.u32.u64.low %v261_v49, %v260_v2  ;;  %v705_v4 = vmul.u32.u64.high %v261_v49, %v260_v2, %v704_v3  ;;  %v707_v5 = vmul.u32.u64.low %v261_v49, %v256_v1  ;;  %v708_v6 = vmul.u32.u64.high %v261_v49, %v256_v1, %v707_v5 }
  0xbc   : > { %vm270_vm7 = vc.u32 %v705_v4, %v707_v5  ;;  %v271_v10 = vadd.s32 1, %v708_v6  ;;  %v269_v22 = vadd.s32 %v707_v5, %v705_v4 }
  0xbe   : > { %v272_v11 = vsel %vm270_vm7, %v271_v10, %v708_v6 }
  0xbf   : > { %v273_v12 = vadd.s32 %v272_v11, %v268_v9 }
  0xc1   : > { %v274_v13 = vadd.s32 536870912, %v273_v12 }
  0xc3   : > { %v275_v14 = vshrl.u32 %v274_v13, 30 }
  0xc5   : > { %v276_v15 = vshll.u32 %v275_v14, 30  ;;  %v299_v39 = vsub.s32 4, %v275_v14 }
  0xc7   : > { %v277_v16 = vsub.s32 %v273_v12, %v276_v15  ;;  %v300_v40 = vsel %vm215_vm9, %v299_v39, %v275_v14 }
  0xc8   : > { %v302_v41 = vsel %vm214_vm10, 0, %v300_v40 }
  0xc9   : > { %v279_v17 = vsub.s32 0, %v277_v16  ;;  %v306_v44 = vand.u32 3, %v302_v41 }
  0xcb   : > { %v460_v18 = vmin.u32 %v279_v17, %v277_v16  ;;  %vm308_vm11 = vcmp.eq.s32.totalorder %v306_v44, 0  ;;  %vm311_vm12 = vcmp.eq.s32.totalorder %v306_v44, 2  ;;  %vm307_vm13 = vcmp.lt.s32.totalorder %v306_v44, 2 }
  0xcd   : > { %v281_v19 = vclz %v460_v18 }
  0xcf   : > { %v461_v21 = vadd.s32 4294967294, %v281_v19 }
  0xd1   : > { %vm462_vm8 = vcmp.lt.s32.totalorder %v461_v21, 0 }
  0xd2   : > { %v284_v24 = vsel %vm462_vm8, 0, %v461_v21 }
  0xd3   : > { %v285_v25 = vsub.s32 32, %v284_v24  ;;  %v286_v26 = vshll.u32 %v277_v16, %v284_v24  ;;  %v289_v27 = vsub.s32 4294967266, %v284_v24 }
  0xd5   : > { %v287_v28 = vshrl.u32 %v269_v22, %v285_v25  ;;  %v290_v29 = vadd.s32 127, %v289_v27 }
  0xd7   : > { %v288_v30 = vor.u32 %v287_v28, %v286_v26  ;;  %v291_v31 = vshll.u32 %v290_v29, 23 }
  0xd9   : > { %v292_v32 = vor.u32 4788187, %v291_v31  ;;  %v295_v33 = vcvt.s32.f32 %v288_v30 }
  0xdb   : > { %v293_v34 = vand.u32 2147483647, %v292_v32 }
  0xdd   : > { %v296_v35 = vmul.f32 %v295_v33, %v293_v34 }
  0xdf   : > { %v297_v36 = vxor.u32 2147483648, %v296_v35 }
  0xe1   : > { %v298_v37 = vsel %vm215_vm9, %v297_v36, %v296_v35 }
  0xe2   : > { %v301_v38 = vsel %vm214_vm10, %v698_v20, %v298_v37 }
  0xe3   : > { %524 = vcosq.f32 %v301_v38 }
  0xe4   : > { %526 = vsinq.f32 %v301_v38 }
  0xed   : > { %v525_v42 = vpop.eup %524 }
  0xee   : > { %v527_v43 = vpop.eup %526  ;;  %v312_v46 = vxor.u32 2147483648, %v525_v42 }
  0xef   : > { %v309_v45 = vxor.u32 2147483648, %v527_v43 }
  0xf0   : > { %v313_v48 = vsel %vm311_vm12, %v312_v46, %v527_v43 }
  0xf1   : > { %v310_v47 = vsel %vm308_vm11, %v525_v42, %v309_v45 }
  0xf2   : > { %v314_v23 = vsel %vm307_vm13, %v310_v47, %v313_v48 }
  0xf3   : > { %v315_v49 = vsel %vm305_vm14, nan, %v314_v23 }
  0xf4   : > { %v338_v52 = vmul.f32 %v315_v49, %v683_v7 }
 0x100   : > { %v322_v50 = vpop.permute.xlu1 %321 }
 0x101   : > { %v323_v51 = vsel %vm317_vm1, %v322_v50, %v683_v7 }
 0x102   : > { %331 = vrot.lane.b32.xlu1 %v323_v51, %s601_s17  ;;  %334 = vrot.lane.b32.xlu0 %v323_v51, %s602_s19 }
 0x106   : > { %340 = vrot.lane.b32.xlu1 %v338_v52, %s594_s7 }
 0x174   : > { %v332_v53 = vpop.permute.xlu1 %331  ;;  %v335_v54 = vpop.permute.xlu0 %334 }
 0x175   : > { %v337_v20 = vsel %vm329_vm15, %v332_v53, %v335_v54 }
 0x176   : > { %v339_v55 = vmul.f32 %v337_v20, %v315_v49 }
 0x178   : > { %v341_v56 = vpop.permute.xlu1 %340  ;;  %351 = vrot.lane.b32.xlu0 %v339_v55, %s594_s7 }
 0x179   : > { %v342_v57 = vsel %vm317_vm1, %v341_v56, %v338_v52 }
 0x17a   : > { %343 = vrot.lane.b32.xlu1 %v342_v57, %s594_s7 }
 0x1ea   : > { %v352_v7 = vpop.permute.xlu0 %351 }
 0x1eb   : > { %v353_v58 = vsel %vm317_vm1, %v352_v7, %v339_v55 }
 0x1ec   : > { %v344_v59 = vpop.permute.xlu1 %343  ;;  %354 = vrot.lane.b32.xlu0 %v353_v58, %s594_s7  ;;  %s534_s7 = scalar_lea.vmem %s533_s6, 256 }
 0x1ed   : > { %v345_v60 = vsel %vm317_vm1, %v344_v59, %v338_v52  ;;  %p536_p1 = scmp.lt.s32.totalorder %s534_s7, %s528_s4 }
 0x1ee   : > { %347 = vrot.lane.b32.xlu1 %v345_v60, %s601_s17 }
 0x1ef   : > { %p537_p2 = por %p536_p1, %p535_p0 }
 0x1f1   : > { %p538_p3 = pnand %p537_p2, %p531_p13 }
 0x25e   : > { %v355_v61 = vpop.permute.xlu0 %354 }
 0x25f   : > { %v356_v62 = vsel %vm317_vm1, %v355_v61, %v339_v55 }
 0x260   : > { %358 = vrot.lane.b32.xlu0 %v356_v62, %s602_s19  ;;  %v348_v63 = vpop.permute.xlu1 %347 }
 0x261   : > { %v350_v1 = vsub.f32 %v338_v52, %v348_v63 }
 0x2d2   : > { %v359_v0 = vpop.permute.xlu0 %358 }
 0x2d3   : > { %v361_v2 = vadd.f32 %v359_v0, %v339_v55 }
 0x2d5   : > { %v362_v3 = vsel %vm329_vm15, %v350_v1, %v361_v2 }
 0x2d6   : > { %364 = vst.msk [vmem:[%s174_s26] sm:$0xff] %vm363_vm0, %v362_v3 }
 0x2d7   : > { %541 = shalt.err (!%p538_p3)
}
 0x2d8   : > { %s542_s8 = scalar_lea.hbm %s738_s30, 128  ;;  %s546_s11 = scalar_lea.hbm %s785_s3, 512 }
 0x2d9   : > { %p543_p4 = scmp.ne.s32.totalorder %s738_s30, %s542_s8  ;;  %p547_p9 = scmp.lt.u32.totalorder %s738_s30, %s785_s3 }
 0x2da   : > { %p548_p10 = scmp.lt.u32.totalorder %s546_s11, %s542_s8  ;;  %p550_p12 = scmp.lt.u32.totalorder %s542_s8, %s738_s30 }
 0x2db   : > { %p544_p7 = pnand %p543_p4, %p662_p5 }
 0x2dc   : > { %p549_p11 = por %p548_p10, %p547_p9 }
 0x2dd   : > { %p545_p8 = pneg %p544_p7 }
 0x2de   : > { %p551_p13 = por %p550_p12, %p549_p11 }
 0x2e0   : > { %p552_p0 = pnand %p551_p13, %p545_p8 }
 0x2e2   : > { %555 = shalt.err (!%p552_p0)
}
 0x2e3   : > { %471 = dma.vmem_to_hbm [thread:$0]  (%p662_p5), %s740_s27, 128, %s738_s30, %s366_s16  }
 0x2e4 PF: > { %p477_p1 = scmp.ge.s32.totalorder %s590_s15, 2  ;;  %s391_s20 = sand.u32 1, %s578_s12  }
 0x2e5   : > { %s392_s24 = scalar_lea.sflag [#allocation3], %s391_s20 }
 0x2e6   : > { %p474_p2 = pnand %p477_p1, %p666_p6 }
 0x2e8   : > { %573 = dma.done.wait (!%p474_p2), %s392_s24, 128  }
 0x2e9   : > { %575 = vsyncadd (!%p474_p2), %s392_s24, 4294967168  ;;  %p13_p3 = scmp.ge.s32.totalorder %s649_s18, 6   ;;  %s788_s12 = smov %s582_s13 }
 0x2ea   : > { %s789_s13 = smov %s586_s14  ;;  %s790_s14 = smov %s660_s21 }
 0x2eb   : > { %s791_s15 = smov %s649_s18  ;;  %15 = sbr.rel (!%p13_p3) target bundleno = 3 (0x3), region = 70 }
 0x2f2   :  { %397 = vsyncpa [#allocation3], 1 }
 0x2f3   :  { %399 = vsyncpa [#allocation3 + $0x1], 1 }

</bundles_post_ra>
